<compile_context>
chip_gen: v5e
topology: v5e:2x2
jax: 0.10.0
libtpu: 0.0.40
codegen_flags: <defaults>
</compile_context>

<pallas_src>
import jax
import jax.numpy as jnp
from jax import lax
from jax.experimental import pallas as pl
from jax.experimental.pallas import tpu as pltpu


def _make_fp_kernel(num_layers, has_points1, s_real, sp, idx_bits):
    """Builds the per-(batch, N-tile) kernel. Ref order:
       xyz1, xyz2T, [points1], points2, layer params..., out
    """
    inv_mask = ~((1 << idx_bits) - 1)   # e.g. -128 for 7 index bits
    int_max = 2 ** 31 - 1

    def kernel(*refs):
        if has_points1:
            x1_r, x2_r, p1_r, p2_r = refs[:4]
            param_refs = refs[4:-1]
        else:
            x1_r, x2_r, p2_r = refs[:3]
            p1_r = None
            param_refs = refs[3:-1]
        out_r = refs[-1]

        q = x1_r[0]            # [3, TN]   dense xyz (native channel-major)
        p = x2_r[0]            # [SP, 3]   sampled xyz (point-major)
        feat2 = p2_r[0]        # [D2, SP]  sampled features (native channel-major)
        tn = q.shape[1]

        # --- squared pairwise distances d[s, n] via 3 broadcast FMAs on the VPU
        #     (no K=3 MXU matmul); guarantees d >= 0 so the f32 bit pattern is
        #     monotone as int32 for the packed argmin below.
        diff = p[:, 0:1] - q[0:1, :]
        d = diff * diff
        for c in (1, 2):
            diff = p[:, c:c + 1] - q[c:c + 1, :]
            d = d + diff * diff

        # --- fused 3-NN: one min-reduction per neighbour --------------------
        # key = (distance bits, low idx_bits of mantissa zeroed) | point index.
        # Keys are unique per column, so (key == min(key)) is an exact one-hot;
        # ties resolve to the smallest index (stable-sort behaviour).  The
        # weight uses the truncated distance (rel. err <= 2^-(23-idx_bits)).
        iota_s = lax.broadcasted_iota(jnp.int32, (sp, tn), 0)
        key = (pltpu.bitcast(d, jnp.int32) & jnp.int32(inv_mask)) | iota_s
        if sp != s_real:                                        # exclude padding
            key = jnp.where(iota_s < s_real, key, jnp.int32(int_max))

        w_acc = jnp.zeros((sp, tn), jnp.float32)  # inv-distance weights at the 3 NN
        w_sum = jnp.zeros((1, tn), jnp.float32)
        for _ in range(3):
            kmin = jnp.min(key, axis=0, keepdims=True)                   # [1, TN]
            sel = key == kmin                                            # exact one-hot
            m = pltpu.bitcast(kmin & jnp.int32(inv_mask), jnp.float32)   # min sq-dist
            wk = pl.reciprocal(jnp.maximum(m, 1e-10))                    # clamp like ref
            w_acc = w_acc + jnp.where(sel, wk, 0.0)
            w_sum = w_sum + wk
            key = jnp.where(sel, jnp.int32(int_max), key)

        # gather-as-matmul on the MXU: [D2, SP] @ [SP, TN] -> [D2, TN]; one
        # reciprocal per column instead of a [D2, TN] divide.
        # TODO(synk): for very large S this dense matmul emulates a 3-element
        # gather; a bf16 cast or index-driven sub-block gather could cut it.
        interp = jnp.dot(feat2, w_acc, preferred_element_type=jnp.float32)
        interp = interp * pl.reciprocal(w_sum)

        # --- MLP: 1x1 conv (+ folded eval-mode BN) + ReLU, channel-major -----
        # First-layer weight is split so the [points1; interp] channel concat
        # becomes a sum of two matmuls (no concat copy).
        if has_points1:
            w0a_r, w0b_r, b0_r = param_refs[0], param_refs[1], param_refs[2]
            h = (jnp.dot(w0a_r[...], p1_r[0], preferred_element_type=jnp.float32)
                 + jnp.dot(w0b_r[...], interp, preferred_element_type=jnp.float32)
                 + b0_r[...])
            rest = param_refs[3:]
        else:
            w0_r, b0_r = param_refs[0], param_refs[1]
            h = jnp.dot(w0_r[...], interp,
                        preferred_element_type=jnp.float32) + b0_r[...]
            rest = param_refs[2:]
        h = jnp.maximum(h, 0.0)
        for li in range(1, num_layers):
            w_r = rest[2 * (li - 1)]
            b_r = rest[2 * (li - 1) + 1]
            h = jnp.maximum(
                jnp.dot(w_r[...], h, preferred_element_type=jnp.float32) + b_r[...],
                0.0)
        # TODO(synk): optionally cast MLP matmul operands to bf16 (f32 accum) on
        # v6e/v7x once validated against the accuracy budget.

        out_r[0] = h.astype(out_r.dtype)     # [C_last, TN] — lane-dense store

    return kernel


def _default_tile_n():
    """Preferred N tile per generation: v7x has only 64 MiB VMEM per core."""
    try:
        kind = jax.devices()[0].device_kind.lower()
    except Exception:
        kind = ""
    if "v6" in kind:
        return 1024
    if "v5" in kind:
        return 512
    return 512   # v7x / unknown


def _choose_tile_n(n, pref):
    t = pref
    while t >= 128:
        if n % t == 0:
            return t
        t //= 2
    # Small or irregular N: process as a single tile.
    # TODO(synk): pad irregular large N instead of using one oversized tile.
    return n


def pointnet_feature_propagation(xyz1, xyz2, points1, points2, params):
    """
    xyz1:    [B, 3, N]   xyz2: [B, 3, S]
    points1: [B, D1, N] or None     points2: [B, D2, S]
    params:  list of (W [Cin, Cout], b [1, Cout]) with BN (eval) folded in.
    returns: [B, C_last, N]  (same NCW layout as the PyTorch module)
    """
    B, _, N = xyz1.shape
    S = xyz2.shape[2]

    # S == 1: the reference broadcasts points2 to every query point. Replicating
    # the single sampled point 3x makes the 3-NN path reproduce that broadcast
    # (three equal weights on identical features).  S == 2 is unsupported, like
    # the reference module.
    if S == 1:
        xyz2 = jnp.tile(xyz2, (1, 1, 3))
        points2 = jnp.tile(points2, (1, 1, 3))
        S = 3

    # Pad the sampled-point axis to a multiple of 128 -> lane-dense [SP, TN]
    # intermediates, unmasked reductions and full MXU tiles.
    SP = max(128, ((S + 127) // 128) * 128)
    if SP != S:
        xyz2 = jnp.pad(xyz2, ((0, 0), (0, 0), (0, SP - S)))
        points2 = jnp.pad(points2, ((0, 0), (0, 0), (0, SP - S)))
    idx_bits = max(1, (SP - 1).bit_length())

    x1 = xyz1.astype(jnp.float32)                               # [B, 3, N]   native
    x2t = jnp.transpose(xyz2, (0, 2, 1)).astype(jnp.float32)    # [B, SP, 3]  (tiny)
    p2 = points2.astype(jnp.float32)                            # [B, D2, SP] native

    has_p1 = points1 is not None
    num_layers = len(params)
    c_last = params[-1][0].shape[1]

    TN = _choose_tile_n(N, _default_tile_n())
    grid = (B, N // TN)

    inputs = [x1, x2t]
    in_specs = [
        pl.BlockSpec((1, 3, TN), lambda b, n: (b, 0, n)),
        pl.BlockSpec((1, SP, 3), lambda b, n: (b, 0, 0)),       # resident over N tiles
    ]
    if has_p1:
        p1 = points1.astype(jnp.float32)                        # [B, D1, N] native
        d1 = p1.shape[1]
        inputs.append(p1)
        in_specs.append(pl.BlockSpec((1, d1, TN), lambda b, n: (b, 0, n)))
    inputs.append(p2)
    in_specs.append(pl.BlockSpec((1, p2.shape[1], SP), lambda b, n: (b, 0, 0)))

    # MLP parameters transposed to channel-major [Cout, Cin] / [Cout, 1]; the
    # first-layer weight is split (points1 part / interpolated part).
    param_arrays = []
    w0, b0 = params[0]
    w0t = jnp.transpose(w0).astype(jnp.float32)
    b0t = jnp.transpose(b0).astype(jnp.float32)
    if has_p1:
        param_arrays += [w0t[:, :d1], w0t[:, d1:], b0t]
    else:
        param_arrays += [w0t, b0t]
    for w, b in params[1:]:
        param_arrays += [jnp.transpose(w).astype(jnp.float32),
                         jnp.transpose(b).astype(jnp.float32)]
    for arr in param_arrays:
        inputs.append(arr)
        in_specs.append(pl.BlockSpec(arr.shape, lambda b, n: (0, 0)))   # resident

    vmem_limit = 96 * 1024 * 1024 if TN >= 1024 else 64 * 1024 * 1024
    kernel = _make_fp_kernel(num_layers, has_p1, S, SP, idx_bits)
    out = pl.pallas_call(
        kernel,
        out_shape=jax.ShapeDtypeStruct((B, c_last, N), jnp.float32),
        grid=grid,
        in_specs=in_specs,
        out_specs=pl.BlockSpec((1, c_last, TN), lambda b, n: (b, 0, n)),
        compiler_params=pltpu.CompilerParams(
            dimension_semantics=("parallel", "parallel"),
            vmem_limit_bytes=vmem_limit),
    )(*inputs)
    return out   # already [B, C_last, N]: no wrapper transpose of the big output


def init_params(key, in_channel, mlp, bn_eps=1e-5):
    """Deterministic Conv1d(1x1)+BatchNorm1d params, BN folded in eval mode."""
    params = []
    last = in_channel
    keys = jax.random.split(key, len(mlp))
    for k, out_c in zip(keys, mlp):
        kw, kb, kg, kbe, km, kv = jax.random.split(k, 6)
        w = 0.1 * jax.random.normal(kw, (last, out_c), jnp.float32)   # conv weight (Cin, Cout)
        b_conv = 0.1 * jax.random.normal(kb, (out_c,), jnp.float32)
        gamma = 1.0 + 0.1 * jax.random.normal(kg, (out_c,), jnp.float32)
        beta = 0.1 * jax.random.normal(kbe, (out_c,), jnp.float32)
        mean = 0.1 * jax.random.normal(km, (out_c,), jnp.float32)
        var = jax.random.uniform(kv, (out_c,), jnp.float32, 0.5, 1.5)
        scale = gamma / jnp.sqrt(var + bn_eps)
        w_f = w * scale[None, :]
        b_f = (b_conv - mean) * scale + beta
        params.append((w_f, b_f.reshape(1, out_c)))
        last = out_c
    return params


def ref_forward(xyz1, xyz2, points1, points2, params):
    """Pure-JAX reference mirroring the PyTorch forward (with folded BN)."""
    x1 = jnp.transpose(xyz1, (0, 2, 1))
    x2 = jnp.transpose(xyz2, (0, 2, 1))
    p2 = jnp.transpose(points2, (0, 2, 1))
    B, N, _ = x1.shape
    S = x2.shape[1]
    if S == 1:
        interp = jnp.broadcast_to(p2, (B, N, p2.shape[-1]))
    else:
        d = (-2.0 * jnp.einsum('bnc,bmc->bnm', x1, x2)
             + jnp.sum(x1 ** 2, -1)[:, :, None]
             + jnp.sum(x2 ** 2, -1)[:, None, :])
        idx = jnp.argsort(d, axis=-1)[:, :, :3]
        dd = jnp.maximum(jnp.take_along_axis(d, idx, axis=-1), 1e-10)
        w = 1.0 / dd
        w = w / jnp.sum(w, -1, keepdims=True)
        gathered = jax.vmap(lambda pts, ix: pts[ix])(p2, idx)   # [B, N, 3, D2]
        interp = jnp.sum(gathered * w[..., None], axis=2)
    if points1 is not None:
        p1 = jnp.transpose(points1, (0, 2, 1))
        h = jnp.concatenate([p1, interp], axis=-1)
    else:
        h = interp
    for w_, b_ in params:
        h = jax.nn.relu(jnp.einsum('bnc,cd->bnd', h, w_) + b_)
    return jnp.transpose(h, (0, 2, 1))


if __name__ == "__main__":
    B, N, S = 2, 16, 8
    D1, D2 = 4, 6
    mlp = [16, 32]

    key = jax.random.PRNGKey(0)
    k_in, k_par = jax.random.split(key)
    kx1, kx2, kp1, kp2 = jax.random.split(k_in, 4)
    xyz1 = jax.random.normal(kx1, (B, 3, N), jnp.float32)
    xyz2 = jax.random.normal(kx2, (B, 3, S), jnp.float32)
    points1 = jax.random.normal(kp1, (B, D1, N), jnp.float32)
    points2 = jax.random.normal(kp2, (B, D2, S), jnp.float32)

    params = init_params(k_par, D1 + D2, mlp)

    out = pointnet_feature_propagation(xyz1, xyz2, points1, points2, params)
    out = jax.block_until_ready(out)

    ref = ref_forward(xyz1, xyz2, points1, points2, params)
    assert out.shape == (B, mlp[-1], N), out.shape
    err = float(jnp.max(jnp.abs(out - ref)))
    assert jnp.allclose(out, ref, atol=1e-4, rtol=1e-4), err

    print("KERNEL_OK")
</pallas_src>

<mosaic_0001>
module attributes {stable_mosaic.version = 11 : i64} {
  func.func @kernel(%arg0: i32, %arg1: i32, %arg2: memref<1x3x16xf32, #tpu.memory_space<vmem>>, %arg3: memref<1x128x3xf32, #tpu.memory_space<vmem>>, %arg4: memref<1x4x16xf32, #tpu.memory_space<vmem>>, %arg5: memref<1x6x128xf32, #tpu.memory_space<vmem>>, %arg6: memref<16x4xf32, #tpu.memory_space<vmem>>, %arg7: memref<16x6xf32, #tpu.memory_space<vmem>>, %arg8: memref<16x1xf32, #tpu.memory_space<vmem>>, %arg9: memref<32x16xf32, #tpu.memory_space<vmem>>, %arg10: memref<32x1xf32, #tpu.memory_space<vmem>>, %arg11: memref<1x32x16xf32, #tpu.memory_space<vmem>>) attributes {dimension_semantics = [#tpu.dimension_semantics<parallel>, #tpu.dimension_semantics<parallel>], iteration_bounds = array<i64: 2, 1>, scalar_prefetch = 0 : i64, scratch_operands = 0 : i64, tpu.core_type = #tpu.core_type<tc>, window_params = [{transform_indices = @transform_0, window_bounds = array<i64: 1, 3, 16>}, {transform_indices = @transform_1, window_bounds = array<i64: 1, 128, 3>}, {transform_indices = @transform_2, window_bounds = array<i64: 1, 4, 16>}, {transform_indices = @transform_3, window_bounds = array<i64: 1, 6, 128>}, {pipeline_mode = #tpu.pipeline_mode<synchronous>, transform_indices = @transform_4, window_bounds = array<i64: 16, 4>}, {pipeline_mode = #tpu.pipeline_mode<synchronous>, transform_indices = @transform_5, window_bounds = array<i64: 16, 6>}, {pipeline_mode = #tpu.pipeline_mode<synchronous>, transform_indices = @transform_6, window_bounds = array<i64: 16, 1>}, {pipeline_mode = #tpu.pipeline_mode<synchronous>, transform_indices = @transform_7, window_bounds = array<i64: 32, 16>}, {pipeline_mode = #tpu.pipeline_mode<synchronous>, transform_indices = @transform_8, window_bounds = array<i64: 32, 1>}, {transform_indices = @transform_9, window_bounds = array<i64: 1, 32, 16>}]} {
    %c0 = arith.constant 0 : index
    %c0_0 = arith.constant 0 : index
    %c0_1 = arith.constant 0 : index
    %0 = vector.load %arg2[%c0, %c0_0, %c0_1] : memref<1x3x16xf32, #tpu.memory_space<vmem>>, vector<1x3x16xf32>
    %1 = vector.shape_cast %0 : vector<1x3x16xf32> to vector<3x16xf32>
    %c0_2 = arith.constant 0 : index
    %c0_3 = arith.constant 0 : index
    %c0_4 = arith.constant 0 : index
    %2 = vector.load %arg3[%c0_2, %c0_3, %c0_4] : memref<1x128x3xf32, #tpu.memory_space<vmem>>, vector<1x128x3xf32>
    %3 = vector.shape_cast %2 : vector<1x128x3xf32> to vector<128x3xf32>
    %c0_5 = arith.constant 0 : index
    %c0_6 = arith.constant 0 : index
    %c0_7 = arith.constant 0 : index
    %4 = vector.load %arg5[%c0_5, %c0_6, %c0_7] : memref<1x6x128xf32, #tpu.memory_space<vmem>>, vector<1x6x128xf32>
    %5 = vector.shape_cast %4 : vector<1x6x128xf32> to vector<6x128xf32>
    %6 = vector.extract_strided_slice %3 {offsets = [0, 0], sizes = [128, 1], strides = [1, 1]} : vector<128x3xf32> to vector<128x1xf32>
    %7 = vector.extract_strided_slice %1 {offsets = [0, 0], sizes = [1, 16], strides = [1, 1]} : vector<3x16xf32> to vector<1x16xf32>
    %8 = vector.broadcast %6 : vector<128x1xf32> to vector<128x16xf32>
    %9 = vector.broadcast %7 : vector<1x16xf32> to vector<128x16xf32>
    %10 = arith.subf %8, %9 : vector<128x16xf32>
    %11 = arith.mulf %10, %10 : vector<128x16xf32>
    %12 = vector.extract_strided_slice %3 {offsets = [0, 1], sizes = [128, 1], strides = [1, 1]} : vector<128x3xf32> to vector<128x1xf32>
    %13 = vector.extract_strided_slice %1 {offsets = [1, 0], sizes = [1, 16], strides = [1, 1]} : vector<3x16xf32> to vector<1x16xf32>
    %14 = vector.broadcast %12 : vector<128x1xf32> to vector<128x16xf32>
    %15 = vector.broadcast %13 : vector<1x16xf32> to vector<128x16xf32>
    %16 = arith.subf %14, %15 : vector<128x16xf32>
    %17 = arith.mulf %16, %16 : vector<128x16xf32>
    %18 = arith.addf %11, %17 : vector<128x16xf32>
    %19 = vector.extract_strided_slice %3 {offsets = [0, 2], sizes = [128, 1], strides = [1, 1]} : vector<128x3xf32> to vector<128x1xf32>
    %20 = vector.extract_strided_slice %1 {offsets = [2, 0], sizes = [1, 16], strides = [1, 1]} : vector<3x16xf32> to vector<1x16xf32>
    %21 = vector.broadcast %19 : vector<128x1xf32> to vector<128x16xf32>
    %22 = vector.broadcast %20 : vector<1x16xf32> to vector<128x16xf32>
    %23 = arith.subf %21, %22 : vector<128x16xf32>
    %24 = arith.mulf %23, %23 : vector<128x16xf32>
    %25 = arith.addf %18, %24 : vector<128x16xf32>
    %26 = tpu.iota {dimensions = array<i32: 0>} : vector<128x16xi32>
    %27 = tpu.bitcast %25 : vector<128x16xf32> -> vector<128x16xi32>
    %c-128_i32 = arith.constant -128 : i32
    %28 = vector.broadcast %c-128_i32 : i32 to vector<128x16xi32>
    %29 = arith.andi %27, %28 : vector<128x16xi32>
    %30 = arith.ori %29, %26 : vector<128x16xi32>
    %c8_i32 = arith.constant 8 : i32
    %31 = vector.broadcast %c8_i32 : i32 to vector<128x16xi32>
    %32 = arith.cmpi slt, %26, %31 : vector<128x16xi32>
    %c2147483647_i32 = arith.constant 2147483647 : i32
    %33 = vector.broadcast %c2147483647_i32 : i32 to vector<128x16xi32>
    %34 = arith.select %32, %30, %33 : vector<128x16xi1>, vector<128x16xi32>
    %cst = arith.constant 0.000000e+00 : f32
    %35 = vector.broadcast %cst : f32 to vector<128x16xf32>
    %cst_8 = arith.constant 0.000000e+00 : f32
    %36 = vector.broadcast %cst_8 : f32 to vector<1x16xf32>
    %cst_9 = arith.constant dense<2147483647> : vector<16xi32>
    %37 = vector.multi_reduction <minsi>, %34, %cst_9 [0] : vector<128x16xi32> to vector<16xi32>
    %38 = vector.shape_cast %37 : vector<16xi32> to vector<1x16xi32>
    %39 = vector.broadcast %38 : vector<1x16xi32> to vector<128x16xi32>
    %40 = arith.cmpi eq, %34, %39 : vector<128x16xi32>
    %c-128_i32_10 = arith.constant -128 : i32
    %41 = vector.broadcast %c-128_i32_10 : i32 to vector<1x16xi32>
    %42 = arith.andi %38, %41 : vector<1x16xi32>
    %43 = tpu.bitcast %42 : vector<1x16xi32> -> vector<1x16xf32>
    %cst_11 = arith.constant 1.000000e-10 : f32
    %44 = vector.broadcast %cst_11 : f32 to vector<1x16xf32>
    %45 = arith.maximumf %43, %44 : vector<1x16xf32>
    %46 = tpu.reciprocal %45 : vector<1x16xf32> -> vector<1x16xf32>
    %cst_12 = arith.constant 0.000000e+00 : f32
    %47 = vector.shape_cast %46 : vector<1x16xf32> to vector<1x16xf32>
    %48 = vector.broadcast %47 : vector<1x16xf32> to vector<128x16xf32>
    %49 = vector.broadcast %cst_12 : f32 to vector<128x16xf32>
    %50 = arith.select %40, %48, %49 : vector<128x16xi1>, vector<128x16xf32>
    %51 = arith.addf %35, %50 : vector<128x16xf32>
    %52 = arith.addf %36, %46 : vector<1x16xf32>
    %c2147483647_i32_13 = arith.constant 2147483647 : i32
    %53 = vector.broadcast %c2147483647_i32_13 : i32 to vector<128x16xi32>
    %54 = arith.select %40, %53, %34 : vector<128x16xi1>, vector<128x16xi32>
    %cst_14 = arith.constant dense<2147483647> : vector<16xi32>
    %55 = vector.multi_reduction <minsi>, %54, %cst_14 [0] : vector<128x16xi32> to vector<16xi32>
    %56 = vector.shape_cast %55 : vector<16xi32> to vector<1x16xi32>
    %57 = vector.broadcast %56 : vector<1x16xi32> to vector<128x16xi32>
    %58 = arith.cmpi eq, %54, %57 : vector<128x16xi32>
    %c-128_i32_15 = arith.constant -128 : i32
    %59 = vector.broadcast %c-128_i32_15 : i32 to vector<1x16xi32>
    %60 = arith.andi %56, %59 : vector<1x16xi32>
    %61 = tpu.bitcast %60 : vector<1x16xi32> -> vector<1x16xf32>
    %cst_16 = arith.constant 1.000000e-10 : f32
    %62 = vector.broadcast %cst_16 : f32 to vector<1x16xf32>
    %63 = arith.maximumf %61, %62 : vector<1x16xf32>
    %64 = tpu.reciprocal %63 : vector<1x16xf32> -> vector<1x16xf32>
    %cst_17 = arith.constant 0.000000e+00 : f32
    %65 = vector.shape_cast %64 : vector<1x16xf32> to vector<1x16xf32>
    %66 = vector.broadcast %65 : vector<1x16xf32> to vector<128x16xf32>
    %67 = vector.broadcast %cst_17 : f32 to vector<128x16xf32>
    %68 = arith.select %58, %66, %67 : vector<128x16xi1>, vector<128x16xf32>
    %69 = arith.addf %51, %68 : vector<128x16xf32>
    %70 = arith.addf %52, %64 : vector<1x16xf32>
    %c2147483647_i32_18 = arith.constant 2147483647 : i32
    %71 = vector.broadcast %c2147483647_i32_18 : i32 to vector<128x16xi32>
    %72 = arith.select %58, %71, %54 : vector<128x16xi1>, vector<128x16xi32>
    %cst_19 = arith.constant dense<2147483647> : vector<16xi32>
    %73 = vector.multi_reduction <minsi>, %72, %cst_19 [0] : vector<128x16xi32> to vector<16xi32>
    %74 = vector.shape_cast %73 : vector<16xi32> to vector<1x16xi32>
    %75 = vector.broadcast %74 : vector<1x16xi32> to vector<128x16xi32>
    %76 = arith.cmpi eq, %72, %75 : vector<128x16xi32>
    %c-128_i32_20 = arith.constant -128 : i32
    %77 = vector.broadcast %c-128_i32_20 : i32 to vector<1x16xi32>
    %78 = arith.andi %74, %77 : vector<1x16xi32>
    %79 = tpu.bitcast %78 : vector<1x16xi32> -> vector<1x16xf32>
    %cst_21 = arith.constant 1.000000e-10 : f32
    %80 = vector.broadcast %cst_21 : f32 to vector<1x16xf32>
    %81 = arith.maximumf %79, %80 : vector<1x16xf32>
    %82 = tpu.reciprocal %81 : vector<1x16xf32> -> vector<1x16xf32>
    %cst_22 = arith.constant 0.000000e+00 : f32
    %83 = vector.shape_cast %82 : vector<1x16xf32> to vector<1x16xf32>
    %84 = vector.broadcast %83 : vector<1x16xf32> to vector<128x16xf32>
    %85 = vector.broadcast %cst_22 : f32 to vector<128x16xf32>
    %86 = arith.select %76, %84, %85 : vector<128x16xi1>, vector<128x16xf32>
    %87 = arith.addf %69, %86 : vector<128x16xf32>
    %88 = arith.addf %70, %82 : vector<1x16xf32>
    %cst_23 = arith.constant dense<0.000000e+00> : vector<6x16xf32>
    %89 = tpu.matmul %5, %87, %cst_23 {dimension_numbers = #tpu.dot_dimension_numbers<[1], [0], [0], [1], [0, 0, 1, 1], [], []>} : vector<6x128xf32>, vector<128x16xf32>, vector<6x16xf32> -> vector<6x16xf32>
    %90 = tpu.reciprocal %88 : vector<1x16xf32> -> vector<1x16xf32>
    %91 = vector.broadcast %90 : vector<1x16xf32> to vector<6x16xf32>
    %92 = arith.mulf %89, %91 : vector<6x16xf32>
    %c0_24 = arith.constant 0 : index
    %c0_25 = arith.constant 0 : index
    %93 = vector.load %arg6[%c0_24, %c0_25] : memref<16x4xf32, #tpu.memory_space<vmem>>, vector<16x4xf32>
    %c0_26 = arith.constant 0 : index
    %c0_27 = arith.constant 0 : index
    %c0_28 = arith.constant 0 : index
    %94 = vector.load %arg4[%c0_26, %c0_27, %c0_28] : memref<1x4x16xf32, #tpu.memory_space<vmem>>, vector<1x4x16xf32>
    %95 = vector.shape_cast %94 : vector<1x4x16xf32> to vector<4x16xf32>
    %cst_29 = arith.constant dense<0.000000e+00> : vector<16x16xf32>
    %96 = tpu.matmul %93, %95, %cst_29 {dimension_numbers = #tpu.dot_dimension_numbers<[1], [0], [0], [1], [0, 0, 1, 1], [], []>} : vector<16x4xf32>, vector<4x16xf32>, vector<16x16xf32> -> vector<16x16xf32>
    %c0_30 = arith.constant 0 : index
    %c0_31 = arith.constant 0 : index
    %97 = vector.load %arg7[%c0_30, %c0_31] : memref<16x6xf32, #tpu.memory_space<vmem>>, vector<16x6xf32>
    %cst_32 = arith.constant dense<0.000000e+00> : vector<16x16xf32>
    %98 = tpu.matmul %97, %92, %cst_32 {dimension_numbers = #tpu.dot_dimension_numbers<[1], [0], [0], [1], [0, 0, 1, 1], [], []>} : vector<16x6xf32>, vector<6x16xf32>, vector<16x16xf32> -> vector<16x16xf32>
    %99 = arith.addf %96, %98 : vector<16x16xf32>
    %c0_33 = arith.constant 0 : index
    %c0_34 = arith.constant 0 : index
    %100 = vector.load %arg8[%c0_33, %c0_34] : memref<16x1xf32, #tpu.memory_space<vmem>>, vector<16x1xf32>
    %101 = vector.broadcast %100 : vector<16x1xf32> to vector<16x16xf32>
    %102 = arith.addf %99, %101 : vector<16x16xf32>
    %cst_35 = arith.constant 0.000000e+00 : f32
    %103 = vector.broadcast %cst_35 : f32 to vector<16x16xf32>
    %104 = arith.maximumf %102, %103 : vector<16x16xf32>
    %c0_36 = arith.constant 0 : index
    %c0_37 = arith.constant 0 : index
    %105 = vector.load %arg9[%c0_36, %c0_37] : memref<32x16xf32, #tpu.memory_space<vmem>>, vector<32x16xf32>
    %cst_38 = arith.constant dense<0.000000e+00> : vector<32x16xf32>
    %106 = tpu.matmul %105, %104, %cst_38 {dimension_numbers = #tpu.dot_dimension_numbers<[1], [0], [0], [1], [0, 0, 1, 1], [], []>} : vector<32x16xf32>, vector<16x16xf32>, vector<32x16xf32> -> vector<32x16xf32>
    %c0_39 = arith.constant 0 : index
    %c0_40 = arith.constant 0 : index
    %107 = vector.load %arg10[%c0_39, %c0_40] : memref<32x1xf32, #tpu.memory_space<vmem>>, vector<32x1xf32>
    %108 = vector.broadcast %107 : vector<32x1xf32> to vector<32x16xf32>
    %109 = arith.addf %106, %108 : vector<32x16xf32>
    %cst_41 = arith.constant 0.000000e+00 : f32
    %110 = vector.broadcast %cst_41 : f32 to vector<32x16xf32>
    %111 = arith.maximumf %109, %110 : vector<32x16xf32>
    %c0_42 = arith.constant 0 : index
    %c0_43 = arith.constant 0 : index
    %c0_44 = arith.constant 0 : index
    %112 = vector.load %arg11[%c0_42, %c0_43, %c0_44] : memref<1x32x16xf32, #tpu.memory_space<vmem>>, vector<1x32x16xf32>
    %113 = vector.shape_cast %112 : vector<1x32x16xf32> to vector<32x16xf32>
    %114 = vector.shape_cast %111 : vector<32x16xf32> to vector<1x32x16xf32>
    tpu.vector_store %arg11[%c0_42, %c0_43, %c0_44], %114 {strides = array<i32>} : memref<1x32x16xf32, #tpu.memory_space<vmem>>, vector<1x32x16xf32>,
    return
  }
  func.func @transform_0(%arg0: i32, %arg1: i32) -> (i32, i32, i32) {
    %c0_i32 = arith.constant 0 : i32
    %c0_i32_0 = arith.constant 0 : i32
    return %arg0, %c0_i32, %arg1 : i32, i32, i32
  }
  func.func @transform_1(%arg0: i32, %arg1: i32) -> (i32, i32, i32) {
    %c0_i32 = arith.constant 0 : i32
    %c0_i32_0 = arith.constant 0 : i32
    %c0_i32_1 = arith.constant 0 : i32
    return %arg0, %c0_i32, %c0_i32_0 : i32, i32, i32
  }
  func.func @transform_2(%arg0: i32, %arg1: i32) -> (i32, i32, i32) {
    %c0_i32 = arith.constant 0 : i32
    %c0_i32_0 = arith.constant 0 : i32
    return %arg0, %c0_i32, %arg1 : i32, i32, i32
  }
  func.func @transform_3(%arg0: i32, %arg1: i32) -> (i32, i32, i32) {
    %c0_i32 = arith.constant 0 : i32
    %c0_i32_0 = arith.constant 0 : i32
    %c0_i32_1 = arith.constant 0 : i32
    return %arg0, %c0_i32, %c0_i32_0 : i32, i32, i32
  }
  func.func @transform_4(%arg0: i32, %arg1: i32) -> (i32, i32) {
    %c0_i32 = arith.constant 0 : i32
    %c0_i32_0 = arith.constant 0 : i32
    %c0_i32_1 = arith.constant 0 : i32
    return %c0_i32, %c0_i32_0 : i32, i32
  }
  func.func @transform_5(%arg0: i32, %arg1: i32) -> (i32, i32) {
    %c0_i32 = arith.constant 0 : i32
    %c0_i32_0 = arith.constant 0 : i32
    %c0_i32_1 = arith.constant 0 : i32
    return %c0_i32, %c0_i32_0 : i32, i32
  }
  func.func @transform_6(%arg0: i32, %arg1: i32) -> (i32, i32) {
    %c0_i32 = arith.constant 0 : i32
    %c0_i32_0 = arith.constant 0 : i32
    %c0_i32_1 = arith.constant 0 : i32
    return %c0_i32, %c0_i32_0 : i32, i32
  }
  func.func @transform_7(%arg0: i32, %arg1: i32) -> (i32, i32) {
    %c0_i32 = arith.constant 0 : i32
    %c0_i32_0 = arith.constant 0 : i32
    %c0_i32_1 = arith.constant 0 : i32
    return %c0_i32, %c0_i32_0 : i32, i32
  }
  func.func @transform_8(%arg0: i32, %arg1: i32) -> (i32, i32) {
    %c0_i32 = arith.constant 0 : i32
    %c0_i32_0 = arith.constant 0 : i32
    %c0_i32_1 = arith.constant 0 : i32
    return %c0_i32, %c0_i32_0 : i32, i32
  }
  func.func @transform_9(%arg0: i32, %arg1: i32) -> (i32, i32, i32) {
    %c0_i32 = arith.constant 0 : i32
    %c0_i32_0 = arith.constant 0 : i32
    return %arg0, %c0_i32, %arg1 : i32, i32, i32
  }
}

</mosaic_0001>

<bundles_post_ra>
// kernel: tpu_custom_call.1
= control target key start
LH: loop header
LB: loop body
LE: loop exit
PB: predicated region body
PF: predicated region fallthrough
CT: control target
= control target key end

     0   :  { %s1785_s30 = smov 0   ;;  %s1787_s10 = smov 0   ;;  %s1928_s0 = inlined_call_operand.vmem [shape: f32[2,3,16], index: 0, kind: input, shape index: {}]   ;;  %s1929_s1 = inlined_call_operand.vmem [shape: f32[2,128,3], index: 1, kind: input, shape index: {}]   ;;  %s1930_s2 = inlined_call_operand.vmem [shape: f32[2,4,16], index: 2, kind: input, shape index: {}]   ;;  %s1931_s3 = inlined_call_operand.vmem [shape: f32[2,6,128], index: 3, kind: input, shape index: {}]   ;;  %s1932_s4 = inlined_call_operand.vmem [shape: f32[16,4], index: 4, kind: input, shape index: {}]   ;;  %s1933_s5 = inlined_call_operand.vmem [shape: f32[16,6], index: 5, kind: input, shape index: {}]   ;;  %s1934_s6 = inlined_call_operand.vmem [shape: f32[16,1], index: 6, kind: input, shape index: {}]   ;;  %s1935_s7 = inlined_call_operand.vmem [shape: f32[32,16], index: 7, kind: input, shape index: {}]   ;;  %s1936_s8 = inlined_call_operand.vmem [shape: f32[32,1], index: 8, kind: input, shape index: {}]   ;;  %s1937_s9 = inlined_call_operand.vmem [shape: f32[2,32,16], index: 9, kind: output, shape index: {}]  }
   0x1   :  { %s1789_s11 = smov 0  }
   0x2 LB: > { %s31_s12 = sadd.s32 1, %s1726_s10  ;;  %p1600_p0 = scmp.ge.s32.totalorder %s1730_s11, 1  ;;  %s1730_s11 = sphi %s1789_s11, %s19_s11   ;;  %s1726_s10 = sphi %s1787_s10, %s1939_s10   ;;  %s1722_s30 = sphi %s1785_s30, %s1938_s30  }
   0x3   : > { %p33_p1 = scmp.ge.s32.totalorder %s31_s12, 2  ;;  %p338_p2 = scmp.lt.s32.totalorder %s1730_s11, 3 }
   0x5   : > { %s1941_s12 = smov (%p33_p1, %s31_s12), 0  ;;  %p339_p3 = pnand %p1600_p0, %p338_p2 }
   0x6   : > { %p395_p4 = scmp.lt.s32.totalorder (!%p339_p3), %s1722_s30, 1 }
   0x7   : > { %342 = sbr.rel (%p339_p3) target bundleno = 713 (0x2c9), region = 56 }
   0xc   : > { %v1732_v0 = vmov 0   ;;  %v1733_v1 = vmov 2   ;;  %s1943_s30 = smov (!%p395_p4, %s1722_s30), 1  ;;  %v1734_v3 = vmov 1   ;;  %v783_v16 = vlaneseq }
   0xd   : > { %1694 = vset.pattern.permute.xlu0 %v1732_v0  ;;  %1696 = vset.pattern.permute.xlu1 %v1733_v1  ;;  %s1665_s13 = sshll.u32 %s1943_s30, 7  ;;  %s1601_s17 = sshll.u32 %s1943_s30, 2  ;;  %vm880_vm0 = vcmask 130048  }
   0xe   : > { %1698 = vset.pattern.permute.xlu2 %v1732_v0  ;;  %s406_s16 = scalar_lea.vmem %s1929_s1, %s1665_s13  ;;  %s401_s20 = scalar_lea.vmem %s1928_s0, %s1601_s17  ;;  %v784_v19 = vshrl.u32 %v783_v16, 7 }
   0xf   : > { %v427_v2 = vld [vmem:[%s406_s16] sm:$0xff]  ;;  %s413_s23 = scalar_lea.vmem %s1930_s2, %s1601_s17  ;;  %s1605_s26 = sshll.u32 %s1943_s30, 3 }
  0x10   : > { %446 = vperm.xlu0 %1694, %v427_v2   ;;  %671 = vperm.xlu1 %1696, %v427_v2   ;;  %v426_v5 = vld [vmem:[%s401_s20] sm:$0x7]  ;;  %s417_s29 = scalar_lea.vmem %s1931_s3, %s1605_s26  ;;  %s1666_s22 = sshll.u32 %s1943_s30, 5 }
  0x11   : > { %v524_v6 = vperm.slane %v426_v5, 0  ;;  %v734_v7 = vperm.slane %v426_v5, 2  ;;  %v621_v9 = vperm.slane %v426_v5, 1  ;;  %s425_s25 = scalar_lea.vmem %s1937_s9, %s1666_s22 }
  0x18   : > { %1695 = vset.pattern.permute.xlu0 %v1734_v3  ;;  %1697 = vset.pattern.permute.xlu1 %v1732_v0 }
  0x19   : > { %558 = vperm.xlu0 %1695, %v427_v2  }
  0x21   : > { %1699 = vset.pattern.permute.xlu0 %v1732_v0 }
  0x82   : > { %v447_v4 = vpop.permute.xlu0 %446  ;;  %v672_v8 = vpop.permute.xlu1 %671 }
  0x83   : > { %v525_v10 = vsub.f32 %v447_v4, %v524_v6  ;;  %v735_v11 = vsub.f32 %v672_v8, %v734_v7 }
  0x85   : > { %v541_v14 = vmul.f32 %v525_v10, %v525_v10  ;;  %v751_v17 = vmul.f32 %v735_v11, %v735_v11 }
  0x8b   : > { %v559_v12 = vpop.permute.xlu0 %558 }
  0x8c   : > { %v622_v13 = vsub.f32 %v559_v12, %v621_v9 }
  0x8e   : > { %v638_v15 = vmul.f32 %v622_v13, %v622_v13 }
  0x90   : > { %v654_v18 = vadd.f32 %v638_v15, %v541_v14 }
  0x92   : > { %v767_v20 = vadd.f32 %v751_v17, %v654_v18 }
  0x94   : > { %v816_v21 = vand.u32 4294967168, %v767_v20 }
  0x96   : > { %v1815_v22 = vor.u32 %v816_v21, %v784_v19 }
  0x98   : > { %v881_v23 = vsel %vm880_vm0, %v1815_v22, 2147483647 }
  0x99   : > { %vm886_vm1 = vcmp.lt.s32.totalorder %v881_v23, 2147483647 }
  0x9a   : > { %v887_v24 = vsel %vm886_vm1, %v881_v23, 2147483647 }
  0x9b   : > { %vm898_vm2 = vcmp.lt.s32.totalorder %v887_v24, 2147483647 }
  0x9c   : > { %v899_v25 = vsel %vm898_vm2, %v887_v24, 2147483647 }
  0x9d   : > { %vm910_vm3 = vcmp.lt.s32.totalorder %v899_v25, 2147483647 }
  0x9e   : > { %v911_v26 = vsel %vm910_vm3, %v899_v25, 2147483647 }
  0x9f   : > { %vm921_vm4 = vcmp.lt.s32.totalorder %v911_v26, 2147483647 }
  0xa0   : > { %v922_v27 = vsel %vm921_vm4, %v911_v26, 2147483647 }
  0xa1   : > { %vm925_vm5 = vcmp.lt.s32.totalorder %v922_v27, 2147483647 }
  0xa2   : > { %v926_v28 = vsel %vm925_vm5, %v922_v27, 2147483647 }
  0xa3   : > { %v927_v29 = vrot.slane %v926_v28, 4 }
  0xa5   : > { %vm928_vm6 = vcmp.lt.s32.totalorder %v926_v28, %v927_v29 }
  0xa6   : > { %v929_v30 = vsel %vm928_vm6, %v926_v28, %v927_v29 }
  0xa7   : > { %v930_v31 = vrot.slane %v929_v30, 2 }
  0xa9   : > { %vm931_vm7 = vcmp.lt.s32.totalorder %v929_v30, %v930_v31 }
  0xaa   : > { %v932_v32 = vsel %vm931_vm7, %v929_v30, %v930_v31 }
  0xab   : > { %v933_v33 = vrot.slane %v932_v32, 1 }
  0xad   : > { %vm934_vm8 = vcmp.lt.s32.totalorder %v932_v32, %v933_v33 }
  0xae   : > { %v1819_v34 = vsel %vm934_vm8, %v932_v32, %v933_v33 }
  0xaf   : > { %vm936_vm9 = vcmp.eq.s32.totalorder %v1815_v22, %v1819_v34  ;;  %v952_v39 = vand.u32 4294967168, %v1819_v34 }
  0xb0   : > { %v1827_v35 = vsel %vm936_vm9, 2147483647, %v1815_v22 }
  0xb1   : > { %v1018_v36 = vsel %vm880_vm0, %v1827_v35, 2147483647  ;;  %v954_v42 = vmax.f32 %v952_v39, 1e-10 }
  0xb2   : > { %vm1023_vm10 = vcmp.lt.s32.totalorder %v1018_v36, 2147483647 }
  0xb3   : > { %v1024_v37 = vsel %vm1023_vm10, %v1018_v36, 2147483647  ;;  %1700 = vrcp.f32 %v954_v42  ;;  %v966_v1 = vand.u32 2147483648, %v954_v42  ;;  %v964_v2 = vand.u32 2147483647, %v954_v42 }
  0xb4   : > { %vm1035_vm11 = vcmp.lt.s32.totalorder %v1024_v37, 2147483647 }
  0xb5   : > { %v1036_v38 = vsel %vm1035_vm11, %v1024_v37, 2147483647  ;;  %vm960_vm11 = vweird.f32 %v954_v42  ;;  %v967_v10 = vor.u32 1.1754944e-38, %v966_v1 }
  0xb6   : > { %vm1047_vm12 = vcmp.lt.s32.totalorder %v1036_v38, 2147483647 }
  0xb7   : > { %v1048_v40 = vsel %vm1047_vm12, %v1036_v38, 2147483647 }
  0xb8   : > { %vm1058_vm13 = vcmp.lt.s32.totalorder %v1048_v40, 2147483647 }
  0xb9   : > { %v1059_v41 = vsel %vm1058_vm13, %v1048_v40, 2147483647  ;;  %v1701_v48 = vpop.eup %1700 }
  0xba   : > { %vm1062_vm14 = vcmp.lt.s32.totalorder %v1059_v41, 2147483647  ;;  %v956_v50 = vmul.f32 %v1701_v48, %v954_v42  ;;  %vm961_vm8 = vweird.f32 %v1701_v48 }
  0xbb   : > { %v1063_v43 = vsel %vm1062_vm14, %v1059_v41, 2147483647  ;;  %vm962_vm12 = vmor %vm960_vm11, %vm961_vm8  ;;  %vm1608_vm8 = vcmp.eq.s32.totalorder %v1819_v34, 2147483647 }
  0xbc   : > { %v1064_v44 = vrot.slane %v1063_v43, 4  ;;  %v957_v56 = vsub.f32 1.0, %v956_v50  ;;  %v1385_v50 = vld [vmem:[%s1934_s6 + $0x8] sm:$0xff] }
  0xbd   : > { %1393 = vperm.xlu1 %1697, %v1385_v50  }
  0xbe   : > { %vm1065_vm15 = vcmp.lt.s32.totalorder %v1063_v43, %v1064_v44  ;;  %v958_v58 = vmul.f32 %v1701_v48, %v957_v56 }
  0xbf   : > { %v1066_v45 = vsel %vm1065_vm15, %v1063_v43, %v1064_v44  ;;  %vm965_vm15 = vcmp.eq.f32.partialorder %v964_v2, 8.507059e+37  ;;  %v1314_v2 = vld [vmem:[%s1933_s5] sm:$0xff] }
  0xc0   : > { %v1067_v46 = vrot.slane %v1066_v45, 2  ;;  %v959_v62 = vadd.f32 %v1701_v48, %v958_v58 }
  0xc2   : > { %vm1068_vm1 = vcmp.lt.s32.totalorder %v1066_v45, %v1067_v46  ;;  %v963_v7 = vsel %vm962_vm12, %v1701_v48, %v959_v62  ;;  %v1312_v48 = vld [vmem:[%s1932_s4 + $0x8] sm:$0xff] }
  0xc3   : > { %v1069_v47 = vsel %vm1068_vm1, %v1066_v45, %v1067_v46  ;;  %v968_v13 = vsel %vm965_vm15, %v967_v10, %v963_v7  ;;  %v1313_v45 = vld [vmem:[%s413_s23] sm:$0xf]  ;;  %vm1350_vm15 = vcmask 31744  }
  0xc4   : > { %v1070_v49 = vrot.slane %v1069_v47, 1  ;;  %v969_v19 = vsel %vm936_vm9, %v968_v13, 0.0  ;;  %v970_v37 = vsel %vm1608_vm8, %v968_v13, 0.0  ;;  %v1311_v46 = vld [vmem:[%s1932_s4] sm:$0xff] }
  0xc6   : > { %vm1071_vm2 = vcmp.lt.s32.totalorder %v1069_v47, %v1070_v49 }
  0xc7   : > { %v1832_v51 = vsel %vm1071_vm2, %v1069_v47, %v1070_v49  ;;  %v443_v47 = vld [vmem:[%s417_s29] sm:$0x3f] }
  0xc8   : > { %vm1073_vm3 = vcmp.eq.s32.totalorder %v1827_v35, %v1832_v51  ;;  %v1089_v52 = vand.u32 4294967168, %v1832_v51  ;;  %vm1623_vm9 = vcmp.eq.s32.totalorder %v1832_v51, 2147483647  ;;  %v1384_v51 = vld [vmem:[%s1934_s6] sm:$0xff] }
  0xc9   : > { %v1841_v53 = vsel %vm1073_vm3, 2147483647, %v1827_v35  ;;  %1388 = vperm.xlu2 %1698, %v1384_v51  }
  0xca   : > { %v1091_v54 = vmax.f32 %v1089_v52, 1e-10  ;;  %v1155_v55 = vsel %vm880_vm0, %v1841_v53, 2147483647 }
  0xcb   : > { %vm1160_vm4 = vcmp.lt.s32.totalorder %v1155_v55, 2147483647 }
  0xcc   : > { %1702 = vrcp.f32 %v1091_v54  ;;  %v1161_v57 = vsel %vm1160_vm4, %v1155_v55, 2147483647  ;;  %v1103_v5 = vand.u32 2147483648, %v1091_v54  ;;  %v1101_v9 = vand.u32 2147483647, %v1091_v54  ;;  %v1404_v55 = vld [vmem:[%s1936_s8] sm:$0xff] }
  0xcd   : > { %vm1172_vm5 = vcmp.lt.s32.totalorder %v1161_v57, 2147483647  ;;  %vm1097_vm1 = vweird.f32 %v1091_v54 }
  0xce   : > { %v1173_v59 = vsel %vm1172_vm5, %v1161_v57, 2147483647  ;;  %v1104_v14 = vor.u32 1.1754944e-38, %v1103_v5  ;;  %vm1102_vm4 = vcmp.eq.f32.partialorder %v1101_v9, 8.507059e+37 }
  0xcf   : > { %vm1184_vm6 = vcmp.lt.s32.totalorder %v1173_v59, 2147483647 }
  0xd0   : > { %v1185_v60 = vsel %vm1184_vm6, %v1173_v59, 2147483647  ;;  %v1406_v59 = vld [vmem:[%s1936_s8 + $0x10] sm:$0xff] }
  0xd1   : > { %vm1195_vm7 = vcmp.lt.s32.totalorder %v1185_v60, 2147483647  ;;  %1410 = vperm.xlu2 %1698, %v1404_v55  }
  0xd2   : > { %v1703_v61 = vpop.eup %1702  ;;  %v1196_v0 = vsel %vm1195_vm7, %v1185_v60, 2147483647 }
  0xd3   : > { %v1093_v63 = vmul.f32 %v1703_v61, %v1091_v54  ;;  %vm1199_vm10 = vcmp.lt.s32.totalorder %v1196_v0, 2147483647  ;;  %vm1098_vm13 = vweird.f32 %v1703_v61  ;;  %v1405_v54 = vld [vmem:[%s1936_s8 + $0x8] sm:$0xff] }
  0xd4   : > { %v1200_v4 = vsel %vm1199_vm10, %v1196_v0, 2147483647  ;;  %vm1099_vm2 = vmor %vm1097_vm1, %vm1098_vm13  ;;  %1415 = vperm.xlu1 %1697, %v1405_v54  }
  0xd5   : > { %v1094_v3 = vsub.f32 1.0, %v1093_v63  ;;  %v1201_v6 = vrot.slane %v1200_v4, 4 }
  0xd7   : > { %v1095_v8 = vmul.f32 %v1703_v61, %v1094_v3  ;;  %vm1202_vm14 = vcmp.lt.s32.totalorder %v1200_v4, %v1201_v6  ;;  %v1315_v3 = vld [vmem:[%s1933_s5 + $0x8] sm:$0xff] }
  0xd8   : > { %v1203_v12 = vsel %vm1202_vm14, %v1200_v4, %v1201_v6  ;;  %vm1357_vm14 = vcmask 1043456  }
  0xd9   : > { %v1096_v11 = vadd.f32 %v1703_v61, %v1095_v8  ;;  %v1204_v15 = vrot.slane %v1203_v12, 2  ;;  %1656 = vmatpush.msk.msra.mxu2 %vm1357_vm14, %v1313_v45  ;;  %1420 = vperm.xlu2 %1698, %v1406_v59  }
  0xda   : > { %1657 = vmatmul.msk.f32.vlgmr.msra.gmra.mxu2 %vm1350_vm15, %v1311_v46 }
  0xdb   : > { %v1100_v16 = vsel %vm1099_vm2, %v1703_v61, %v1096_v11  ;;  %vm1205_vm5 = vcmp.lt.s32.totalorder %v1203_v12, %v1204_v15 }
  0xdc   : > { %v1105_v17 = vsel %vm1102_vm4, %v1104_v14, %v1100_v16  ;;  %v1206_v18 = vsel %vm1205_vm5, %v1203_v12, %v1204_v15  ;;  %v1407_v12 = vld [vmem:[%s1936_s8 + $0x18] sm:$0xff] }
  0xdd   : > { %v1106_v20 = vsel %vm1073_vm3, %v1105_v17, 0.0  ;;  %v1138_v21 = vadd.f32 %v1105_v17, %v968_v13  ;;  %v1207_v23 = vrot.slane %v1206_v18, 1  ;;  %v1107_v33 = vsel %vm1623_vm9, %v1105_v17, 0.0  ;;  %1425 = vperm.xlu0 %1699, %v1407_v12   ;;  %v1400_v17 = vld [vmem:[%s1935_s7] sm:$0xff] }
  0xde   : > { %v1122_v24 = vadd.f32 %v1106_v20, %v969_v19  ;;  %v1123_v39 = vadd.f32 %v1107_v33, %v970_v37  ;;  %v1402_v19 = vld [vmem:[%s1935_s7 + $0x10] sm:$0xff]  ;;  %v1403_v20 = vld [vmem:[%s1935_s7 + $0x18] sm:$0xff] }
  0xdf   : > { %vm1208_vm6 = vcmp.lt.s32.totalorder %v1206_v18, %v1207_v23 }
  0xe0   : > { %v1209_v25 = vsel %vm1208_vm6, %v1206_v18, %v1207_v23  ;;  %vm1323_vm6 = vcmask 1045504   ;;  %v1401_v18 = vld [vmem:[%s1935_s7 + $0x8] sm:$0xff] }
  0xe1   : > { %v1226_v26 = vand.u32 4294967168, %v1209_v25  ;;  %vm1638_vm12 = vcmp.eq.s32.totalorder %v1209_v25, 2147483647  ;;  %vm1210_vm13 = vcmp.eq.s32.totalorder %v1841_v53, %v1209_v25 }
  0xe2   : > { %1658 = vmatmul.msk.f32.gmra.mxu2 %vm1350_vm15, %v1312_v48 }
  0xe3   : > { %v1228_v27 = vmax.f32 %v1226_v26, 1e-10 }
  0xe5   : > { %1704 = vrcp.f32 %v1228_v27  ;;  %v1240_v31 = vand.u32 2147483648, %v1228_v27  ;;  %v1238_v22 = vand.u32 2147483647, %v1228_v27  ;;  %vm1234_vm3 = vweird.f32 %v1228_v27 }
  0xe7   : > { %v1241_v36 = vor.u32 1.1754944e-38, %v1240_v31  ;;  %vm1239_vm11 = vcmp.eq.f32.partialorder %v1238_v22, 8.507059e+37 }
  0xeb   : > { %v1705_v28 = vpop.eup %1704 }
  0xec   : > { %v1230_v29 = vmul.f32 %v1705_v28, %v1228_v27  ;;  %vm1235_vm7 = vweird.f32 %v1705_v28 }
  0xed   : > { %vm1236_vm10 = vmor %vm1234_vm3, %vm1235_vm7  ;;  %vm1316_vm7 = vcmask 48128  }
  0xee   : > { %v1231_v30 = vsub.f32 1.0, %v1230_v29 }
  0xf0   : > { %v1232_v32 = vmul.f32 %v1705_v28, %v1231_v30 }
  0xf2   : > { %v1233_v35 = vadd.f32 %v1705_v28, %v1232_v32 }
  0xf4   : > { %v1237_v38 = vsel %vm1236_vm10, %v1705_v28, %v1233_v35 }
  0xf5   : > { %v1242_v40 = vsel %vm1239_vm11, %v1241_v36, %v1237_v38 }
  0xf6   : > { %v1244_v41 = vsel %vm1638_vm12, %v1242_v40, 0.0  ;;  %v1243_v42 = vsel %vm1210_vm13, %v1242_v40, 0.0  ;;  %v1275_v43 = vadd.f32 %v1242_v40, %v1138_v21 }
  0xf7   : > { %v1260_v44 = vadd.f32 %v1244_v41, %v1123_v39  ;;  %v1259_v34 = vadd.f32 %v1243_v42, %v1122_v24 }
  0xf8   : > { %1706 = vrcp.f32 %v1275_v43  ;;  %v1307_v58 = vand.u32 2147483648, %v1275_v43  ;;  %vm1301_vm2 = vweird.f32 %v1275_v43  ;;  %v1305_v60 = vand.u32 2147483647, %v1275_v43 }
  0xf9   : > { %1276 = vmatpush.msra.mxu0 %v1260_v44 }
  0xfa   : > { %v1308_v62 = vor.u32 1.1754944e-38, %v1307_v58  ;;  %vm1306_vm5 = vcmp.eq.f32.partialorder %v1305_v60, 8.507059e+37 }
  0xfb   : > { %1277 = vmatpush.msra.mxu0 %v1260_v44 }
  0xfd   : > { %1278 = vmatpush.msra.mxu0 %v1260_v44 }
  0xfe   : > { %v1707_v49 = vpop.eup %1706 }
  0xff   : > { %1279 = vmatpush.msra.mxu0 %v1260_v44  ;;  %v1297_v52 = vmul.f32 %v1707_v49, %v1275_v43  ;;  %vm1302_vm1 = vweird.f32 %v1707_v49 }
 0x100   : > { %vm1303_vm4 = vmor %vm1301_vm2, %vm1302_vm1 }
 0x101   : > { %1280 = vmatpush.msra.mxu0 %v1260_v44  ;;  %v1298_v53 = vsub.f32 1.0, %v1297_v52 }
 0x103   : > { %1281 = vmatpush.msra.mxu0 %v1260_v44  ;;  %v1299_v56 = vmul.f32 %v1707_v49, %v1298_v53 }
 0x105   : > { %1282 = vmatpush.msra.mxu0 %v1260_v44  ;;  %v1300_v57 = vadd.f32 %v1707_v49, %v1299_v56 }
 0x107   : > { %1283 = vmatpush.msra.mxu0 %v1260_v44  ;;  %v1304_v61 = vsel %vm1303_vm4, %v1707_v49, %v1300_v57 }
 0x108   : > { %v1309_v0 = vsel %vm1306_vm5, %v1308_v62, %v1304_v61 }
 0x109   : > { %1284 = vmatpush.msra.mxu0 %v1260_v44 }
 0x10b   : > { %1285 = vmatpush.msra.mxu0 %v1260_v44 }
 0x10d   : > { %1286 = vmatpush.msra.mxu0 %v1260_v44 }
 0x10f   : > { %1287 = vmatpush.msra.mxu0 %v1260_v44 }
 0x111   : > { %1288 = vmatpush.msra.mxu0 %v1260_v44 }
 0x113   : > { %1289 = vmatpush.msra.mxu0 %v1260_v44 }
 0x115   : > { %1290 = vmatpush.msra.mxu0 %v1260_v44 }
 0x117   : > { %1291 = vmatpush.msra.mxu0 %v1259_v34 }
 0x118   : > { %1292 = vmatmul.f32.vlgmr.msra.gmra.mxu0 %v443_v47 }
 0x123   : > { %v1389_v10 = vpop.permute.xlu2 %1388 }
 0x12b   : > { %v1411_v21 = vpop.permute.xlu2 %1410 }
 0x12f   : > { %v1394_v11 = vpop.permute.xlu1 %1393 }
 0x133   : > { %v1421_v30 = vpop.permute.xlu2 %1420 }
 0x146   : > { %v1416_v26 = vpop.permute.xlu1 %1415 }
 0x14f   : > { %v1426_v33 = vpop.permute.xlu0 %1425 }
 0x15d   : > { %v1378_v4 = vpop.f32.mrf.mxu2 }
 0x165   : > { %v1381_v6 = vpop.f32.mrf.mxu2 }
 0x195   : > { %v1293_v63 = vpop.f32.mrf.mxu0 }
 0x196   : > { %v1310_v1 = vmul.f32 %v1309_v0, %v1293_v63 }
 0x198   : > { %1653 = vmatpush.msk.msra.mxu1 %vm1323_vm6, %v1310_v1 }
 0x199   : > { %1654 = vmatmul.msk.f32.vlgmr.msra.gmra.mxu1 %vm1316_vm7, %v1314_v2 }
 0x1a1   : > { %1655 = vmatmul.msk.f32.gmra.mxu1 %vm1316_vm7, %v1315_v3 }
 0x216   : > { %v1344_v5 = vpop.f32.mrf.mxu1 }
 0x217   : > { %v1379_v7 = vadd.f32 %v1378_v4, %v1344_v5 }
 0x219   : > { %v1396_v14 = vadd.f32 %v1389_v10, %v1379_v7 }
 0x21b   : > { %v1398_v16 = vmax.f32 %v1396_v14, 0.0 }
 0x21e   : > { %v1347_v8 = vpop.f32.mrf.mxu1 }
 0x21f   : > { %v1382_v9 = vadd.f32 %v1381_v6, %v1347_v8 }
 0x221   : > { %v1397_v13 = vadd.f32 %v1394_v11, %v1382_v9 }
 0x223   : > { %v1399_v15 = vmax.f32 %v1397_v13, 0.0 }
 0x225   : > { %1454 = vmatpush.msra.mxu3 %v1399_v15 }
 0x227   : > { %1455 = vmatpush.msra.mxu3 %v1398_v16 }
 0x228   : > { %1659 = vmatmul.msk.f32.vlgmr.msra.gmra.mxu3 %vm880_vm0, %v1400_v17 }
 0x230   : > { %1660 = vmatmul.msk.f32.gmra.mxu3 %vm880_vm0, %v1401_v18 }
 0x238   : > { %1661 = vmatmul.msk.f32.gmra.mxu3 %vm880_vm0, %v1402_v19 }
 0x240   : > { %1662 = vmatmul.msk.f32.gmra.mxu3 %vm880_vm0, %v1403_v20 }
 0x2ab   : > { %v1457_v23 = vpop.f32.mrf.mxu3 }
 0x2ac   : > { %v1458_v24 = vadd.f32 %v1457_v23, %v1411_v21 }
 0x2ae   : > { %v1469_v25 = vmax.f32 %v1458_v24, 0.0 }
 0x2b0   : > { %1473 = vst.msk [vmem:[%s425_s25] sm:$0xff] %vm880_vm0, %v1469_v25 }
 0x2b3   : > { %v1460_v27 = vpop.f32.mrf.mxu3 }
 0x2b4   : > { %v1461_v28 = vadd.f32 %v1460_v27, %v1416_v26 }
 0x2b6   : > { %v1470_v29 = vmax.f32 %v1461_v28, 0.0 }
 0x2b8   : > { %1474 = vst.msk [vmem:[%s425_s25 + $0x8] sm:$0xff] %vm880_vm0, %v1470_v29 }
 0x2bb   : > { %v1463_v31 = vpop.f32.mrf.mxu3 }
 0x2bc   : > { %v1464_v32 = vadd.f32 %v1463_v31, %v1421_v30 }
 0x2be   : > { %v1471_v22 = vmax.f32 %v1464_v32, 0.0 }
 0x2c0   : > { %1475 = vst.msk [vmem:[%s425_s25 + $0x10] sm:$0xff] %vm880_vm0, %v1471_v22 }
 0x2c3   : > { %v1466_v35 = vpop.f32.mrf.mxu3 }
 0x2c4   : > { %v1467_v36 = vadd.f32 %v1466_v35, %v1426_v33 }
 0x2c6   : > { %v1472_v37 = vmax.f32 %v1467_v36, 0.0 }
 0x2c8   : > { %1476 = vst.msk [vmem:[%s425_s25 + $0x18] sm:$0xff] %vm880_vm0, %v1472_v37 }
 0x2c9 PF: > { %s19_s11 = sadd.s32 1, %s1730_s11   ;;  %s1938_s30 = smov %s1726_s10 }
 0x2ca   : > { %p16_p5 = scmp.ge.s32.totalorder %s19_s11, 4   ;;  %s1939_s10 = smov %s1941_s12 }
 0x2cc   :  { %18 = sbr.rel (!%p16_p5) target bundleno = 2 (0x2), region = 95 }

</bundles_post_ra>
